<compile_context>
chip_gen: v5e
topology: v5e:2x2
jax: 0.10.0
libtpu: 0.0.40
codegen_flags: <defaults>
</compile_context>

<pallas_src>
import functools

import jax
import jax.numpy as jnp
from jax.experimental import pallas as pl
from jax.experimental.pallas import tpu as pltpu


def _user_encoder_kernel(
    hist_ref,    # (TB, H, D) VMEM, history vectors for TB batches
    cand_ref,    # (TB, C, D) VMEM, candidate vectors for TB batches
    mh_ref,      # (TB, 1, H) VMEM, hist mask (1.0 / 0.0)
    mc_ref,      # (TB, C, 1) VMEM, cand mask (1.0 / 0.0)
    uc_ref,      # (1, D)     VMEM, folded weight acting on the cand half
    uh_ref,      # (1, D)     VMEM, folded weight acting on the hist half
    const_ref,   # (1, 1)     VMEM, folded bias  (b1·w2 + b2)
    out_ref,     # (TB, C, D) VMEM, user vectors
):
    tb = hist_ref.shape[0]
    uc = uc_ref[...]          # (1, D)
    uh = uh_ref[...]          # (1, D)
    c0 = const_ref[...]       # (1, 1)
    neg = jnp.finfo(jnp.float32).min

    # Short static loop over the batches in this block (TB is small).
    for b in range(tb):
        hist = hist_ref[b]    # (H, D)
        cand = cand_ref[b]    # (C, D)

        # score[c,h] = cand[c]·uc + hist[h]·uh + const   (w2 folded; exact)
        s_c = jnp.einsum('cd,xd->cx', cand, uc,
                         preferred_element_type=jnp.float32)      # (C, 1)
        s_h = jnp.einsum('xd,hd->xh', uh, hist,
                         preferred_element_type=jnp.float32)      # (1, H)
        score = s_c + s_h + c0                                    # (C, H)

        # Mask invalid history entries, softmax over H (lane axis).
        mh = mh_ref[b]                                            # (1, H)
        masked = jnp.where(mh > 0.0, score, neg)
        m = jnp.max(masked, axis=-1, keepdims=True)               # (C, 1)
        e = jnp.exp(masked - m)                                   # (C, H)
        s = jnp.sum(e, axis=-1, keepdims=True)                    # (C, 1)
        r = pl.reciprocal(s, approx=True)                         # EUP slot
        r = r * (2.0 - s * r)                                     # Newton step -> ~f32 exact
        wts = e * r                                               # (C, H)

        # Zero whole rows for invalid candidates.
        mc = mc_ref[b]                                            # (C, 1)
        wts = jnp.where(mc > 0.0, wts, 0.0)

        # user_vector = weights @ hist   (MXU)
        user = jnp.dot(wts, hist, preferred_element_type=jnp.float32)  # (C, D)
        out_ref[b] = user.astype(out_ref.dtype)


@functools.partial(jax.jit, static_argnames=("tb",))
def user_encoder_forward(hist, cand, mask_hist, mask_cand, w1, b1, w2, b2, tb=8):
    """hist: (B,H,D) f32, cand: (B,C,D) f32, mask_*: bool. Returns (B,C,D) f32."""
    B, H, D = hist.shape
    C = cand.shape[1]

    # Fold the second Linear into the first (exact, since no nonlinearity):
    #   Linear2(Linear1(concat(c, h))) = c·(W1_c @ w2) + h·(W1_h @ w2) + b1·w2 + b2
    uc = (w1[:D, :] @ w2).reshape(1, D).astype(jnp.float32)   # acts on cand half
    uh = (w1[D:, :] @ w2).reshape(1, D).astype(jnp.float32)   # acts on hist half
    const = (jnp.dot(b1, w2) + b2).reshape(1, 1).astype(jnp.float32)

    mh = mask_hist.astype(jnp.float32).reshape(B, 1, H)
    mc = mask_cand.astype(jnp.float32).reshape(B, C, 1)

    # Block TB batches per grid step (pad batch if needed; padded rows have
    # all-zero masks and vectors, which produce all-zero outputs safely).
    TB = min(tb, B)
    Bp = ((B + TB - 1) // TB) * TB
    if Bp != B:
        pad = Bp - B
        hist = jnp.pad(hist, ((0, pad), (0, 0), (0, 0)))
        cand = jnp.pad(cand, ((0, pad), (0, 0), (0, 0)))
        mh = jnp.pad(mh, ((0, pad), (0, 0), (0, 0)))
        mc = jnp.pad(mc, ((0, pad), (0, 0), (0, 0)))

    grid_spec = pltpu.PrefetchScalarGridSpec(
        num_scalar_prefetch=0,
        grid=(Bp // TB,),
        in_specs=[
            pl.BlockSpec((TB, H, D), lambda i: (i, 0, 0)),   # hist (per block)
            pl.BlockSpec((TB, C, D), lambda i: (i, 0, 0)),   # cand (per block)
            pl.BlockSpec((TB, 1, H), lambda i: (i, 0, 0)),   # hist mask
            pl.BlockSpec((TB, C, 1), lambda i: (i, 0, 0)),   # cand mask
            pl.BlockSpec((1, D), lambda i: (0, 0)),          # folded W1_cand @ w2
            pl.BlockSpec((1, D), lambda i: (0, 0)),          # folded W1_hist @ w2
            pl.BlockSpec((1, 1), lambda i: (0, 0)),          # folded bias
        ],
        out_specs=pl.BlockSpec((TB, C, D), lambda i: (i, 0, 0)),
    )

    out = pl.pallas_call(
        _user_encoder_kernel,
        out_shape=jax.ShapeDtypeStruct((Bp, C, D), jnp.float32),
        grid_spec=grid_spec,
        compiler_params=pltpu.CompilerParams(
            dimension_semantics=("parallel",)),
    )(hist, cand, mh, mc, uc, uh, const)

    return out[:B]


def reference_forward(hist, cand, mask_hist, mask_cand, w1, b1, w2, b2):
    """Pure-JAX mirror of the PyTorch forward (for verification)."""
    B, H, D = hist.shape
    C = cand.shape[1]
    exp_cand = jnp.broadcast_to(cand[:, :, None, :], (B, C, H, D))
    rep_hist = jnp.broadcast_to(hist[:, None, :, :], (B, C, H, D))
    concat = jnp.concatenate([exp_cand, rep_hist], axis=-1)        # (B,C,H,2D)
    hid = concat @ w1 + b1                                         # (B,C,H,K)
    score = jnp.squeeze(hid @ w2[:, None], axis=-1) + b2           # (B,C,H)
    mh = mask_hist[:, None, :]                                     # (B,1,H)
    mc = mask_cand[:, :, None]                                     # (B,C,1)
    masked = jnp.where(mh, score, jnp.finfo(score.dtype).min)
    wts = jax.nn.softmax(masked, axis=-1)
    wts = jnp.where(mc, wts, 0.0)
    return jnp.einsum("bch,bhd->bcd", wts, hist)


if __name__ == "__main__":
    # Small shapes: batch=2, history_len=8, num_candidates=4,
    # input_dim=16, hidden_dim=32.
    B, H, C, D, K = 2, 8, 4, 16, 32

    key = jax.random.PRNGKey(0)
    k_hist, k_cand, k_w1, k_b1, k_w2, k_b2 = jax.random.split(key, 6)

    hist = jax.random.normal(k_hist, (B, H, D), dtype=jnp.float32)
    cand = jax.random.normal(k_cand, (B, C, D), dtype=jnp.float32)

    # Deterministic parameter init (Linear(2D->K), Linear(K->1)).
    w1 = jax.random.normal(k_w1, (2 * D, K), dtype=jnp.float32) * 0.1
    b1 = jax.random.normal(k_b1, (K,), dtype=jnp.float32) * 0.1
    w2 = jax.random.normal(k_w2, (K,), dtype=jnp.float32) * 0.1
    b2 = jax.random.normal(k_b2, (), dtype=jnp.float32) * 0.1

    # Length-style boolean masks (some invalid entries to exercise masking).
    hist_lens = jnp.array([6, 3], dtype=jnp.int32)
    cand_lens = jnp.array([4, 2], dtype=jnp.int32)
    mask_hist = jnp.arange(H)[None, :] < hist_lens[:, None]        # (B, H) bool
    mask_cand = jnp.arange(C)[None, :] < cand_lens[:, None]        # (B, C) bool

    out = user_encoder_forward(hist, cand, mask_hist, mask_cand, w1, b1, w2, b2)
    out = jax.block_until_ready(out)

    ref = reference_forward(hist, cand, mask_hist, mask_cand, w1, b1, w2, b2)
    assert out.shape == (B, C, D)
    assert jnp.allclose(out, ref, atol=1e-3, rtol=1e-3), (
        f"max abs diff {jnp.max(jnp.abs(out - ref))}")

    print("KERNEL_OK")
</pallas_src>

<mosaic_0001>
module attributes {stable_mosaic.version = 11 : i64} {
  func.func @_user_encoder_kernel(%arg0: i32, %arg1: memref<2x8x16xf32, #tpu.memory_space<vmem>>, %arg2: memref<2x4x16xf32, #tpu.memory_space<vmem>>, %arg3: memref<2x1x8xf32, #tpu.memory_space<vmem>>, %arg4: memref<2x4x1xf32, #tpu.memory_space<vmem>>, %arg5: memref<1x16xf32, #tpu.memory_space<vmem>>, %arg6: memref<1x16xf32, #tpu.memory_space<vmem>>, %arg7: memref<1x1xf32, #tpu.memory_space<vmem>>, %arg8: memref<2x4x16xf32, #tpu.memory_space<vmem>>) attributes {dimension_semantics = [#tpu.dimension_semantics<parallel>], iteration_bounds = array<i64: 1>, scalar_prefetch = 0 : i64, scratch_operands = 0 : i64, tpu.core_type = #tpu.core_type<tc>, window_params = [{transform_indices = @transform_0, window_bounds = array<i64: 2, 8, 16>}, {transform_indices = @transform_1, window_bounds = array<i64: 2, 4, 16>}, {transform_indices = @transform_2, window_bounds = array<i64: 2, 1, 8>}, {transform_indices = @transform_3, window_bounds = array<i64: 2, 4, 1>}, {pipeline_mode = #tpu.pipeline_mode<synchronous>, transform_indices = @transform_4, window_bounds = array<i64: 1, 16>}, {pipeline_mode = #tpu.pipeline_mode<synchronous>, transform_indices = @transform_5, window_bounds = array<i64: 1, 16>}, {pipeline_mode = #tpu.pipeline_mode<synchronous>, transform_indices = @transform_6, window_bounds = array<i64: 1, 1>}, {transform_indices = @transform_7, window_bounds = array<i64: 2, 4, 16>}]} {
    %c0 = arith.constant 0 : index
    %c0_0 = arith.constant 0 : index
    %0 = vector.load %arg5[%c0, %c0_0] : memref<1x16xf32, #tpu.memory_space<vmem>>, vector<1x16xf32>
    %c0_1 = arith.constant 0 : index
    %c0_2 = arith.constant 0 : index
    %1 = vector.load %arg6[%c0_1, %c0_2] : memref<1x16xf32, #tpu.memory_space<vmem>>, vector<1x16xf32>
    %c0_3 = arith.constant 0 : index
    %c0_4 = arith.constant 0 : index
    %2 = vector.load %arg7[%c0_3, %c0_4] : memref<1x1xf32, #tpu.memory_space<vmem>>, vector<1x1xf32>
    %c0_5 = arith.constant 0 : index
    %c0_6 = arith.constant 0 : index
    %c0_7 = arith.constant 0 : index
    %3 = vector.load %arg1[%c0_5, %c0_6, %c0_7] : memref<2x8x16xf32, #tpu.memory_space<vmem>>, vector<1x8x16xf32>
    %4 = vector.shape_cast %3 : vector<1x8x16xf32> to vector<8x16xf32>
    %c0_8 = arith.constant 0 : index
    %c0_9 = arith.constant 0 : index
    %c0_10 = arith.constant 0 : index
    %5 = vector.load %arg2[%c0_8, %c0_9, %c0_10] : memref<2x4x16xf32, #tpu.memory_space<vmem>>, vector<1x4x16xf32>
    %6 = vector.shape_cast %5 : vector<1x4x16xf32> to vector<4x16xf32>
    "tpu.trace_start"() <{level = 10 : i32, message = "cd,xd->cx"}> : () -> ()
    %cst = arith.constant dense<0.000000e+00> : vector<4x1xf32>
    %7 = tpu.matmul %6, %0, %cst {dimension_numbers = #tpu.dot_dimension_numbers<[1], [1], [0], [0], [0, 0, 1, 0], [], []>} : vector<4x16xf32>, vector<1x16xf32>, vector<4x1xf32> -> vector<4x1xf32>
    "tpu.trace_stop"() : () -> ()
    "tpu.trace_start"() <{level = 10 : i32, message = "xd,hd->xh"}> : () -> ()
    %cst_11 = arith.constant dense<0.000000e+00> : vector<1x8xf32>
    %8 = tpu.matmul %1, %4, %cst_11 {dimension_numbers = #tpu.dot_dimension_numbers<[1], [1], [0], [0], [0, 0, 1, 0], [], []>} : vector<1x16xf32>, vector<8x16xf32>, vector<1x8xf32> -> vector<1x8xf32>
    "tpu.trace_stop"() : () -> ()
    %9 = vector.broadcast %7 : vector<4x1xf32> to vector<4x8xf32>
    %10 = vector.broadcast %8 : vector<1x8xf32> to vector<4x8xf32>
    %11 = arith.addf %9, %10 : vector<4x8xf32>
    %12 = vector.broadcast %2 : vector<1x1xf32> to vector<4x8xf32>
    %13 = arith.addf %11, %12 : vector<4x8xf32>
    %c0_12 = arith.constant 0 : index
    %c0_13 = arith.constant 0 : index
    %c0_14 = arith.constant 0 : index
    %14 = vector.load %arg3[%c0_12, %c0_13, %c0_14] : memref<2x1x8xf32, #tpu.memory_space<vmem>>, vector<1x1x8xf32>
    %15 = vector.shape_cast %14 : vector<1x1x8xf32> to vector<1x8xf32>
    %cst_15 = arith.constant 0.000000e+00 : f32
    %16 = vector.broadcast %cst_15 : f32 to vector<1x8xf32>
    %17 = arith.cmpf ogt, %15, %16 : vector<1x8xf32>
    %cst_16 = arith.constant -3.40282347E+38 : f32
    %18 = vector.shape_cast %17 : vector<1x8xi1> to vector<1x8xi1>
    %19 = vector.broadcast %18 : vector<1x8xi1> to vector<4x8xi1>
    %20 = vector.broadcast %cst_16 : f32 to vector<4x8xf32>
    %21 = arith.select %19, %13, %20 : vector<4x8xi1>, vector<4x8xf32>
    %cst_17 = arith.constant dense<0xFF800000> : vector<4xf32>
    %22 = vector.multi_reduction <maximumf>, %21, %cst_17 [1] : vector<4x8xf32> to vector<4xf32>
    %23 = vector.shape_cast %22 : vector<4xf32> to vector<4x1xf32>
    %24 = vector.broadcast %23 : vector<4x1xf32> to vector<4x8xf32>
    %25 = arith.subf %21, %24 : vector<4x8xf32>
    %26 = math.exp %25 : vector<4x8xf32>
    %cst_18 = arith.constant dense<0.000000e+00> : vector<4xf32>
    %27 = vector.multi_reduction <add>, %26, %cst_18 [1] : vector<4x8xf32> to vector<4xf32>
    %28 = vector.shape_cast %27 : vector<4xf32> to vector<4x1xf32>
    %29 = tpu.reciprocal %28 {approx = true} : vector<4x1xf32> -> vector<4x1xf32>
    %30 = arith.mulf %28, %29 : vector<4x1xf32>
    %cst_19 = arith.constant 2.000000e+00 : f32
    %31 = vector.broadcast %cst_19 : f32 to vector<4x1xf32>
    %32 = arith.subf %31, %30 : vector<4x1xf32>
    %33 = arith.mulf %29, %32 : vector<4x1xf32>
    %34 = vector.broadcast %33 : vector<4x1xf32> to vector<4x8xf32>
    %35 = arith.mulf %26, %34 : vector<4x8xf32>
    %c0_20 = arith.constant 0 : index
    %c0_21 = arith.constant 0 : index
    %c0_22 = arith.constant 0 : index
    %36 = vector.load %arg4[%c0_20, %c0_21, %c0_22] : memref<2x4x1xf32, #tpu.memory_space<vmem>>, vector<1x4x1xf32>
    %37 = vector.shape_cast %36 : vector<1x4x1xf32> to vector<4x1xf32>
    %cst_23 = arith.constant 0.000000e+00 : f32
    %38 = vector.broadcast %cst_23 : f32 to vector<4x1xf32>
    %39 = arith.cmpf ogt, %37, %38 : vector<4x1xf32>
    %cst_24 = arith.constant 0.000000e+00 : f32
    %40 = vector.shape_cast %39 : vector<4x1xi1> to vector<4x1xi1>
    %41 = vector.broadcast %40 : vector<4x1xi1> to vector<4x8xi1>
    %42 = vector.broadcast %cst_24 : f32 to vector<4x8xf32>
    %43 = arith.select %41, %35, %42 : vector<4x8xi1>, vector<4x8xf32>
    %cst_25 = arith.constant dense<0.000000e+00> : vector<4x16xf32>
    %44 = tpu.matmul %43, %4, %cst_25 {dimension_numbers = #tpu.dot_dimension_numbers<[1], [0], [0], [1], [0, 0, 1, 1], [], []>} : vector<4x8xf32>, vector<8x16xf32>, vector<4x16xf32> -> vector<4x16xf32>
    %c0_26 = arith.constant 0 : index
    %c0_27 = arith.constant 0 : index
    %c0_28 = arith.constant 0 : index
    %45 = vector.load %arg8[%c0_26, %c0_27, %c0_28] : memref<2x4x16xf32, #tpu.memory_space<vmem>>, vector<1x4x16xf32>
    %46 = vector.shape_cast %45 : vector<1x4x16xf32> to vector<4x16xf32>
    %47 = vector.shape_cast %44 : vector<4x16xf32> to vector<1x4x16xf32>
    tpu.vector_store %arg8[%c0_26, %c0_27, %c0_28], %47 {strides = array<i32>} : memref<2x4x16xf32, #tpu.memory_space<vmem>>, vector<1x4x16xf32>,
    %c1 = arith.constant 1 : index
    %c0_29 = arith.constant 0 : index
    %c0_30 = arith.constant 0 : index
    %48 = vector.load %arg1[%c1, %c0_29, %c0_30] : memref<2x8x16xf32, #tpu.memory_space<vmem>>, vector<1x8x16xf32>
    %49 = vector.shape_cast %48 : vector<1x8x16xf32> to vector<8x16xf32>
    %c1_31 = arith.constant 1 : index
    %c0_32 = arith.constant 0 : index
    %c0_33 = arith.constant 0 : index
    %50 = vector.load %arg2[%c1_31, %c0_32, %c0_33] : memref<2x4x16xf32, #tpu.memory_space<vmem>>, vector<1x4x16xf32>
    %51 = vector.shape_cast %50 : vector<1x4x16xf32> to vector<4x16xf32>
    "tpu.trace_start"() <{level = 10 : i32, message = "cd,xd->cx"}> : () -> ()
    %cst_34 = arith.constant dense<0.000000e+00> : vector<4x1xf32>
    %52 = tpu.matmul %51, %0, %cst_34 {dimension_numbers = #tpu.dot_dimension_numbers<[1], [1], [0], [0], [0, 0, 1, 0], [], []>} : vector<4x16xf32>, vector<1x16xf32>, vector<4x1xf32> -> vector<4x1xf32>
    "tpu.trace_stop"() : () -> ()
    "tpu.trace_start"() <{level = 10 : i32, message = "xd,hd->xh"}> : () -> ()
    %cst_35 = arith.constant dense<0.000000e+00> : vector<1x8xf32>
    %53 = tpu.matmul %1, %49, %cst_35 {dimension_numbers = #tpu.dot_dimension_numbers<[1], [1], [0], [0], [0, 0, 1, 0], [], []>} : vector<1x16xf32>, vector<8x16xf32>, vector<1x8xf32> -> vector<1x8xf32>
    "tpu.trace_stop"() : () -> ()
    %54 = vector.broadcast %52 : vector<4x1xf32> to vector<4x8xf32>
    %55 = vector.broadcast %53 : vector<1x8xf32> to vector<4x8xf32>
    %56 = arith.addf %54, %55 : vector<4x8xf32>
    %57 = vector.broadcast %2 : vector<1x1xf32> to vector<4x8xf32>
    %58 = arith.addf %56, %57 : vector<4x8xf32>
    %c1_36 = arith.constant 1 : index
    %c0_37 = arith.constant 0 : index
    %c0_38 = arith.constant 0 : index
    %59 = vector.load %arg3[%c1_36, %c0_37, %c0_38] : memref<2x1x8xf32, #tpu.memory_space<vmem>>, vector<1x1x8xf32>
    %60 = vector.shape_cast %59 : vector<1x1x8xf32> to vector<1x8xf32>
    %cst_39 = arith.constant 0.000000e+00 : f32
    %61 = vector.broadcast %cst_39 : f32 to vector<1x8xf32>
    %62 = arith.cmpf ogt, %60, %61 : vector<1x8xf32>
    %cst_40 = arith.constant -3.40282347E+38 : f32
    %63 = vector.shape_cast %62 : vector<1x8xi1> to vector<1x8xi1>
    %64 = vector.broadcast %63 : vector<1x8xi1> to vector<4x8xi1>
    %65 = vector.broadcast %cst_40 : f32 to vector<4x8xf32>
    %66 = arith.select %64, %58, %65 : vector<4x8xi1>, vector<4x8xf32>
    %cst_41 = arith.constant dense<0xFF800000> : vector<4xf32>
    %67 = vector.multi_reduction <maximumf>, %66, %cst_41 [1] : vector<4x8xf32> to vector<4xf32>
    %68 = vector.shape_cast %67 : vector<4xf32> to vector<4x1xf32>
    %69 = vector.broadcast %68 : vector<4x1xf32> to vector<4x8xf32>
    %70 = arith.subf %66, %69 : vector<4x8xf32>
    %71 = math.exp %70 : vector<4x8xf32>
    %cst_42 = arith.constant dense<0.000000e+00> : vector<4xf32>
    %72 = vector.multi_reduction <add>, %71, %cst_42 [1] : vector<4x8xf32> to vector<4xf32>
    %73 = vector.shape_cast %72 : vector<4xf32> to vector<4x1xf32>
    %74 = tpu.reciprocal %73 {approx = true} : vector<4x1xf32> -> vector<4x1xf32>
    %75 = arith.mulf %73, %74 : vector<4x1xf32>
    %cst_43 = arith.constant 2.000000e+00 : f32
    %76 = vector.broadcast %cst_43 : f32 to vector<4x1xf32>
    %77 = arith.subf %76, %75 : vector<4x1xf32>
    %78 = arith.mulf %74, %77 : vector<4x1xf32>
    %79 = vector.broadcast %78 : vector<4x1xf32> to vector<4x8xf32>
    %80 = arith.mulf %71, %79 : vector<4x8xf32>
    %c1_44 = arith.constant 1 : index
    %c0_45 = arith.constant 0 : index
    %c0_46 = arith.constant 0 : index
    %81 = vector.load %arg4[%c1_44, %c0_45, %c0_46] : memref<2x4x1xf32, #tpu.memory_space<vmem>>, vector<1x4x1xf32>
    %82 = vector.shape_cast %81 : vector<1x4x1xf32> to vector<4x1xf32>
    %cst_47 = arith.constant 0.000000e+00 : f32
    %83 = vector.broadcast %cst_47 : f32 to vector<4x1xf32>
    %84 = arith.cmpf ogt, %82, %83 : vector<4x1xf32>
    %cst_48 = arith.constant 0.000000e+00 : f32
    %85 = vector.shape_cast %84 : vector<4x1xi1> to vector<4x1xi1>
    %86 = vector.broadcast %85 : vector<4x1xi1> to vector<4x8xi1>
    %87 = vector.broadcast %cst_48 : f32 to vector<4x8xf32>
    %88 = arith.select %86, %80, %87 : vector<4x8xi1>, vector<4x8xf32>
    %cst_49 = arith.constant dense<0.000000e+00> : vector<4x16xf32>
    %89 = tpu.matmul %88, %49, %cst_49 {dimension_numbers = #tpu.dot_dimension_numbers<[1], [0], [0], [1], [0, 0, 1, 1], [], []>} : vector<4x8xf32>, vector<8x16xf32>, vector<4x16xf32> -> vector<4x16xf32>
    %c1_50 = arith.constant 1 : index
    %c0_51 = arith.constant 0 : index
    %c0_52 = arith.constant 0 : index
    %90 = vector.load %arg8[%c1_50, %c0_51, %c0_52] : memref<2x4x16xf32, #tpu.memory_space<vmem>>, vector<1x4x16xf32>
    %91 = vector.shape_cast %90 : vector<1x4x16xf32> to vector<4x16xf32>
    %92 = vector.shape_cast %89 : vector<4x16xf32> to vector<1x4x16xf32>
    tpu.vector_store %arg8[%c1_50, %c0_51, %c0_52], %92 {strides = array<i32>} : memref<2x4x16xf32, #tpu.memory_space<vmem>>, vector<1x4x16xf32>,
    return
  }
  func.func @transform_0(%arg0: i32) -> (i32, i32, i32) {
    %c0_i32 = arith.constant 0 : i32
    %c0_i32_0 = arith.constant 0 : i32
    %c0_i32_1 = arith.constant 0 : i32
    return %arg0, %c0_i32, %c0_i32_0 : i32, i32, i32
  }
  func.func @transform_1(%arg0: i32) -> (i32, i32, i32) {
    %c0_i32 = arith.constant 0 : i32
    %c0_i32_0 = arith.constant 0 : i32
    %c0_i32_1 = arith.constant 0 : i32
    return %arg0, %c0_i32, %c0_i32_0 : i32, i32, i32
  }
  func.func @transform_2(%arg0: i32) -> (i32, i32, i32) {
    %c0_i32 = arith.constant 0 : i32
    %c0_i32_0 = arith.constant 0 : i32
    %c0_i32_1 = arith.constant 0 : i32
    return %arg0, %c0_i32, %c0_i32_0 : i32, i32, i32
  }
  func.func @transform_3(%arg0: i32) -> (i32, i32, i32) {
    %c0_i32 = arith.constant 0 : i32
    %c0_i32_0 = arith.constant 0 : i32
    %c0_i32_1 = arith.constant 0 : i32
    return %arg0, %c0_i32, %c0_i32_0 : i32, i32, i32
  }
  func.func @transform_4(%arg0: i32) -> (i32, i32) {
    %c0_i32 = arith.constant 0 : i32
    %c0_i32_0 = arith.constant 0 : i32
    %c0_i32_1 = arith.constant 0 : i32
    return %c0_i32, %c0_i32_0 : i32, i32
  }
  func.func @transform_5(%arg0: i32) -> (i32, i32) {
    %c0_i32 = arith.constant 0 : i32
    %c0_i32_0 = arith.constant 0 : i32
    %c0_i32_1 = arith.constant 0 : i32
    return %c0_i32, %c0_i32_0 : i32, i32
  }
  func.func @transform_6(%arg0: i32) -> (i32, i32) {
    %c0_i32 = arith.constant 0 : i32
    %c0_i32_0 = arith.constant 0 : i32
    %c0_i32_1 = arith.constant 0 : i32
    return %c0_i32, %c0_i32_0 : i32, i32
  }
  func.func @transform_7(%arg0: i32) -> (i32, i32, i32) {
    %c0_i32 = arith.constant 0 : i32
    %c0_i32_0 = arith.constant 0 : i32
    %c0_i32_1 = arith.constant 0 : i32
    return %arg0, %c0_i32, %c0_i32_0 : i32, i32, i32
  }
}

</mosaic_0001>

<bundles_post_ra>
// kernel: user_encoder_forward.1
= control target key start
LH: loop header
LB: loop body
LE: loop exit
PB: predicated region body
PF: predicated region fallthrough
CT: control target
= control target key end

     0   :  { %s384_s0 = inlined_call_operand.vmem [shape: f32[2,8,16], index: 0, kind: input, shape index: {}]   ;;  %s385_s1 = inlined_call_operand.vmem [shape: f32[2,4,16], index: 1, kind: input, shape index: {}]   ;;  %s386_s2 = inlined_call_operand.vmem [shape: f32[2,1,8], index: 2, kind: input, shape index: {}]   ;;  %s387_s3 = inlined_call_operand.vmem [shape: f32[2,4,1], index: 3, kind: input, shape index: {}]   ;;  %s388_s4 = inlined_call_operand.vmem [shape: f32[1,16], index: 4, kind: input, shape index: {}]   ;;  %s389_s5 = inlined_call_operand.vmem [shape: f32[1,16], index: 5, kind: input, shape index: {}]   ;;  %s390_s6 = inlined_call_operand.<no memory space> [shape: f32[1,1], index: 6, kind: input, shape index: {}]   ;;  %s391_s7 = inlined_call_operand.hbm [shape: f32[2,4,16], index: 7, kind: output, shape index: {}]  }
   0x1   :  { %v12_v0 = vstv %s390_s6 }
   0x2   :  { %13 = vst [vmem:[#allocation2] sm:$0x1] %v12_v0 }
   0x3   :  { %vm42_vm0 = vcmask 130048   ;;  %v242_v1 = vld [vmem:[%s384_s0 + $0x8] sm:$0xff]  ;;  %v30_v2 = vld [vmem:[%s389_s5] sm:$0x1]  ;;  %v243_v4 = vld [vmem:[%s385_s1 + $0x4] sm:$0xf] }
   0x4   :  { %244 = vmatpush.xpose.msk.msra.mxu2 %vm42_vm0, %v242_v1  ;;  %v256_v3 = vld [vmem:[%s388_s4] ss:$0 sm:$0xff]  ;;  %214 = vmatpush.msra.mxu3 %v242_v1  ;;  %vm38_vm1 = vcmask 125952   ;;  %v292_v9 = vmov 0  }
   0x5   :  { %v32_v5 = vld [vmem:[%s384_s0] sm:$0xff]  ;;  %v136_v7 = vmul.f32 %v256_v3, %v243_v4  ;;  %253 = vset.pattern.permute.xlu0 %v292_v9  ;;  %255 = vset.pattern.permute.xlu1 %v292_v9 }
   0x6   :  { %239 = vmatpush.xpose.msk.msra.mxu0 %vm42_vm0, %v32_v5  ;;  %v33_v6 = vld [vmem:[%s385_s1] sm:$0xf]  ;;  %126 = vmatpush.msra.mxu1 %v32_v5 }
   0x7   :  { %v37_v8 = vmul.f32 %v256_v3, %v33_v6 }
   0x8   :  { %14 = vsyncpa [#allocation4], 0  ;;  %245 = vmatmul.msk.f32.vlgmr.msra.gmra.mxu2 %vm42_vm0, %v30_v2  ;;  %254 = vset.pattern.permute.xlu2 %v292_v9  ;;  %v137_v10 = vsel %vm38_vm1, %v136_v7, 0.0  ;;  %v246_v13 = vld [vmem:[%s386_s2 + $0x1] sm:$0x1]  ;;  %vm84_vm6 = vcmask 60416  }
   0x9   :  { %240 = vmatmul.msk.f32.vlgmr.msra.gmra.mxu0 %vm42_vm0, %v30_v2  ;;  %v39_v11 = vsel %vm38_vm1, %v37_v8, 0.0  ;;  %138 = vadd.xlane.f32.xlu0 %v137_v10  ;;  %v257_v12 = vld [vmem:[#allocation2] ss:$0 sm:$0xff]  ;;  %vm168_vm2 = vcmp.gt.f32.partialorder %v246_v13, 0.0  ;;  %v247_v45 = vld [vmem:[%s387_s3 + $0x4] sm:$0xf] }
   0xa   :  { %40 = vadd.xlane.f32.xlu1 %v39_v11  ;;  %v78_v14 = vld [vmem:[%s386_s2] sm:$0x1]  ;;  %v169_v18 = vsel %vm168_vm2, 1, %v292_v9  ;;  %vm189_vm8 = vcmp.gt.f32.partialorder %v247_v45, 0.0  ;;  %vm107_vm10 = vcmask 64512   ;;  %s227_s20 = sshll.u32 %s391_s7, 4  ;;  %s228_s20 = int_to_ptr.hbm [resolvable:$true] %s227_s20 }
   0xb   :  { %vm79_vm3 = vcmp.gt.f32.partialorder %v78_v14, 0.0  ;;  %v170_v23 = vperm.slane %v169_v18, 0  ;;  %v99_v44 = vld [vmem:[%s387_s3] sm:$0xf]  ;;  %v190_v47 = vsel %vm189_vm8, 1, %v292_v9  ;;  %s293_s3 = smov [#allocation3]  }
   0xc   :  { %v80_v19 = vsel %vm79_vm3, 1, %v292_v9  ;;  %vm100_vm7 = vcmp.gt.f32.partialorder %v99_v44, 0.0  ;;  %s225_s17 = sshll.u32 %s293_s3, 4  ;;  %s294_s21 = smov 64   ;;  %s226_s17 = int_to_ptr.vmem [resolvable:$true] %s225_s17 }
   0xd   :  { %v81_v24 = vperm.slane %v80_v19, 0  ;;  %vm171_vm4 = vcmp.eq.s32.totalorder %v170_v23, 1  ;;  %v101_v46 = vsel %vm100_vm7, 1, %v292_v9  ;;  %s295_s22 = smov 4  }
   0xf   :  { %vm82_vm5 = vcmp.eq.s32.totalorder %v81_v24, 1 }
  0x1d   :  { %74 = vperm.xlu0 %253, %v257_v12  }
  0x7c   :  { %v139_v16 = vpop.xlane.xlu0 %138 }
  0x7d   :  { %v41_v20 = vpop.xlane.xlu1 %40 }
  0x86   :  { %v66_v15 = vpop.f32.mrf.mxu0 }
  0x87   :  { %v69_v17 = vperm.slane %v66_v15, 0 }
  0x89   :  { %v70_v25 = vadd.f32 %v69_v17, %v41_v20 }
  0x8b   :  { %v160_v21 = vpop.f32.mrf.mxu2 }
  0x8c   :  { %v163_v22 = vperm.slane %v160_v21, 0 }
  0x8e   :  { %v164_v26 = vadd.f32 %v163_v22, %v139_v16 }
  0x8f   :  { %v75_v27 = vpop.permute.xlu0 %74 }
  0x90   :  { %v77_v28 = vadd.f32 %v75_v27, %v70_v25  ;;  %v165_v29 = vadd.f32 %v164_v26, %v75_v27 }
  0x92   :  { %v172_v30 = vsel %vm171_vm4, %v165_v29, -3.4028235e+38  ;;  %v83_v31 = vsel %vm82_vm5, %v77_v28, -3.4028235e+38 }
  0x93   :  { %v173_v32 = vsel %vm84_vm6, %v172_v30, -inf  ;;  %v85_v33 = vsel %vm84_vm6, %v83_v31, -inf }
  0x94   :  { %174 = vmax.xlane.f32.xlu1 %v173_v32  ;;  %86 = vmax.xlane.f32.xlu2 %v85_v33 }
 0x107   :  { %v87_v34 = vpop.xlane.xlu2 %86  ;;  %v175_v35 = vpop.xlane.xlu1 %174 }
 0x108   :  { %v88_v36 = vsub.f32 %v83_v31, %v87_v34  ;;  %v176_v37 = vsub.f32 %v172_v30, %v175_v35 }
 0x10a   :  { %v89_v38 = vmul.f32 1.442695, %v88_v36  ;;  %v177_v39 = vmul.f32 1.442695, %v176_v37 }
 0x10c   :  { %258 = vpow2.f32 %v89_v38 }
 0x10d   :  { %260 = vpow2.f32 %v177_v39 }
 0x112   :  { %v259_v40 = vpop.eup %258 }
 0x113   :  { %v261_v41 = vpop.eup %260  ;;  %v91_v42 = vsel %vm84_vm6, %v259_v40, 0.0 }
 0x114   :  { %92 = vadd.xlane.f32.xlu1 %v91_v42  ;;  %v179_v43 = vsel %vm84_vm6, %v261_v41, 0.0 }
 0x115   :  { %180 = vadd.xlane.f32.xlu2 %v179_v43 }
 0x12d   :  { %103 = vperm.xlu1 %255, %v101_v46   ;;  %192 = vperm.xlu2 %254, %v190_v47  }
 0x187   :  { %v93_v48 = vpop.xlane.xlu1 %92 }
 0x188   :  { %v181_v49 = vpop.xlane.xlu2 %180 }
 0x189   :  { %262 = vrcp.f32 %v181_v49 }
 0x18a   :  { %264 = vrcp.f32 %v93_v48 }
 0x18f   :  { %v263_v50 = vpop.eup %262 }
 0x190   :  { %v265_v51 = vpop.eup %264  ;;  %v183_v52 = vmul.f32 %v263_v50, %v181_v49  ;;  %v193_v54 = vpop.permute.xlu2 %192 }
 0x191   :  { %v95_v55 = vmul.f32 %v265_v51, %v93_v48  ;;  %vm194_vm9 = vcmp.eq.s32.totalorder %v193_v54, 1 }
 0x192   :  { %v184_v53 = vsub.f32 2.0, %v183_v52 }
 0x193   :  { %v96_v58 = vsub.f32 2.0, %v95_v55 }
 0x194   :  { %v185_v56 = vmul.f32 %v263_v50, %v184_v53 }
 0x195   :  { %v97_v60 = vmul.f32 %v265_v51, %v96_v58 }
 0x196   :  { %v186_v57 = vmul.f32 %v261_v41, %v185_v56 }
 0x197   :  { %v98_v61 = vmul.f32 %v259_v40, %v97_v60 }
 0x198   :  { %v195_v59 = vsel %vm194_vm9, %v186_v57, 0.0 }
 0x199   :  { %248 = vmatmul.msk.f32.vlgmr.msra.gmra.mxu3 %vm107_vm10, %v195_v59 }
 0x19f   :  { %v104_v62 = vpop.permute.xlu1 %103 }
 0x1a0   :  { %vm105_vm11 = vcmp.eq.s32.totalorder %v104_v62, 1 }
 0x1a1   :  { %v106_v63 = vsel %vm105_vm11, %v98_v61, 0.0 }
 0x1a2   :  { %241 = vmatmul.msk.f32.vlgmr.msra.gmra.mxu1 %vm107_vm10, %v106_v63 }
 0x21c   :  { %v216_v0 = vpop.f32.mrf.mxu3 }
 0x21d   :  { %220 = vst.msk [vmem:[#allocation3 + $0x4] sm:$0xf] %vm38_vm1, %v216_v0 }
 0x21f   :  { %v128_v1 = vpop.f32.mrf.mxu1 }
 0x220   :  { %131 = vst.msk [vmem:[#allocation3] sm:$0xf] %vm38_vm1, %v128_v1 }
 0x221   :  { %233 = dma.vmem_to_hbm [thread:$0]  %s226_s17, 128, %s228_s20, [#allocation4], %s294_s21, %s294_s21, %s295_s22  }
 0x222   :  { %290 = dma.done.wait [#allocation4], 128  }
 0x223   :  { %291 = vsyncadd [#allocation4], 4294967168 }
 0x224   :  { %238 = vsyncpa [#allocation4], 1 }

</bundles_post_ra>
